<compile_context>
chip_gen: v7x
topology: tpu7x:2x2x1
jax: 0.10.0
libtpu: 0.0.40
codegen_flags: <defaults>
</compile_context>

<pallas_src>
import functools

import jax
import jax.numpy as jnp
from jax.experimental import pallas as pl
from jax.experimental.pallas import tpu as pltpu


# ----------------------------------------------------------------------------
# Tiled projection matmul
# ----------------------------------------------------------------------------
def _pick_tile(dim, preferred, align):
    """Largest multiple of `align` <= preferred that divides `dim`; else the full
    dim (block == array extent is always a legal Pallas block)."""
    best = None
    t = align
    while t <= min(dim, preferred):
        if dim % t == 0:
            best = t
        t += align
    return best if best is not None else dim


def _matmul_kernel(x_ref, w_ref, o_ref, acc_ref, *, mxu_dtype):
    @pl.when(pl.program_id(2) == 0)
    def _init():
        acc_ref[...] = jnp.zeros_like(acc_ref)

    acc_ref[...] += jnp.dot(
        x_ref[...].astype(mxu_dtype),
        w_ref[...].astype(mxu_dtype),
        preferred_element_type=jnp.float32,
    )

    @pl.when(pl.program_id(2) == pl.num_programs(2) - 1)
    def _store():
        o_ref[...] = acc_ref[...].astype(o_ref.dtype)


def _matmul_bias_kernel(x_ref, w_ref, b_ref, o_ref, acc_ref, *, mxu_dtype):
    @pl.when(pl.program_id(2) == 0)
    def _init():
        acc_ref[...] = jnp.zeros_like(acc_ref)

    acc_ref[...] += jnp.dot(
        x_ref[...].astype(mxu_dtype),
        w_ref[...].astype(mxu_dtype),
        preferred_element_type=jnp.float32,
    )

    @pl.when(pl.program_id(2) == pl.num_programs(2) - 1)
    def _store():
        o_ref[...] = (acc_ref[...] + b_ref[...].astype(jnp.float32)).astype(o_ref.dtype)


def pallas_matmul(x, w, b=None, *, tm=512, tn=256, tk=512, mxu_dtype=jnp.bfloat16):
    """x: (M, K) @ w: (K, N) [+ b: (1, N)] as a tiled, pipelined Pallas kernel."""
    M, K = x.shape
    K2, N = w.shape
    assert K == K2
    tm = _pick_tile(M, tm, 8)
    tn = _pick_tile(N, tn, 128)
    tk = _pick_tile(K, tk, 128)
    grid = (M // tm, N // tn, K // tk)

    itemsize = jnp.dtype(x.dtype).itemsize
    cost = pl.CostEstimate(
        flops=2 * M * N * K,
        transcendentals=0,
        bytes_accessed=(M * K + K * N + M * N + (N if b is not None else 0)) * itemsize,
    )
    cparams = pltpu.CompilerParams(
        dimension_semantics=("parallel", "parallel", "arbitrary"),
        vmem_limit_bytes=48 * 1024 * 1024,
    )
    x_spec = pl.BlockSpec((tm, tk), lambda i, j, k: (i, k))
    w_spec = pl.BlockSpec((tk, tn), lambda i, j, k: (k, j))
    o_spec = pl.BlockSpec((tm, tn), lambda i, j, k: (i, j))
    scratch = [pltpu.VMEM((tm, tn), jnp.float32)]

    if b is None:
        return pl.pallas_call(
            functools.partial(_matmul_kernel, mxu_dtype=mxu_dtype),
            out_shape=jax.ShapeDtypeStruct((M, N), x.dtype),
            grid=grid,
            in_specs=[x_spec, w_spec],
            out_specs=o_spec,
            scratch_shapes=scratch,
            compiler_params=cparams,
            cost_estimate=cost,
        )(x, w)
    b_spec = pl.BlockSpec((1, tn), lambda i, j, k: (0, j))
    return pl.pallas_call(
        functools.partial(_matmul_bias_kernel, mxu_dtype=mxu_dtype),
        out_shape=jax.ShapeDtypeStruct((M, N), x.dtype),
        grid=grid,
        in_specs=[x_spec, w_spec, b_spec],
        out_specs=o_spec,
        scratch_shapes=scratch,
        compiler_params=cparams,
        cost_estimate=cost,
    )(x, w, b)


# ----------------------------------------------------------------------------
# Flow-attention core (lane-dense, head-grouped)
# ----------------------------------------------------------------------------
def _flow_attention_kernel(q_ref, k_ref, v_ref, o_ref, *, G, D, nk, n_ratio,
                           inv_vdiv, mxu_dtype):
    eps = 1e-6
    f32 = jnp.float32
    GD = G * D

    # Constant 0/1 head-segment selectors (VPU iota + compare). Matmuls against them
    # run the per-head lane reductions / broadcasts on the otherwise-idle MXU instead
    # of VPU-multiply + XLU lane-reduce.
    seg = (jax.lax.broadcasted_iota(jnp.int32, (GD, G), 0) // D
           == jax.lax.broadcasted_iota(jnp.int32, (GD, G), 1)).astype(f32)        # (GD, G)
    segT = (jax.lax.broadcasted_iota(jnp.int32, (G, GD), 0)
            == jax.lax.broadcasted_iota(jnp.int32, (G, GD), 1) // D).astype(f32)  # (G, GD)
    blk = (jax.lax.broadcasted_iota(jnp.int32, (GD, GD), 0) // D
           == jax.lax.broadcasted_iota(jnp.int32, (GD, GD), 1) // D).astype(f32)  # (GD, GD)

    def seg_reduce(xw):   # (N, GD) -> (N, G): per-head sum over that head's D lanes
        return jnp.dot(xw, seg, preferred_element_type=f32)

    def expand(y):        # (N, G) -> (N, GD): per-head scalar broadcast to D lanes
        return jnp.dot(y, segT, preferred_element_type=f32)

    q = jax.nn.sigmoid(q_ref[...].astype(f32))      # kernel(q), (N, GD)
    k = jax.nn.sigmoid(k_ref[...].astype(f32))      # kernel(k)
    v = v_ref[...].astype(f32) * inv_vdiv           # v / (scale*C // heads)

    k_sum = jnp.sum(k, axis=0, keepdims=True)       # (1, GD)
    q_sum = jnp.sum(q, axis=0, keepdims=True)       # (1, GD)

    # my_sum(a, b) == per-head sum over D -> (N, G); reciprocals on the EUP
    sink_incoming = pl.reciprocal(
        seg_reduce((q + eps) * (k_sum + eps)) + eps, approx=True)
    source_outgoing = pl.reciprocal(
        seg_reduce((k + eps) * (q_sum + eps)) + eps, approx=True)

    sink_in_e = expand(sink_incoming)                                         # (N, GD)
    k_w_sum = jnp.sum(k * expand(source_outgoing), axis=0, keepdims=True)     # (1, GD)
    q_w_sum = jnp.sum(q * sink_in_e, axis=0, keepdims=True)                   # (1, GD)

    conserved_sink = seg_reduce((q + eps) * (k_w_sum + eps)) + eps            # (N, G)
    conserved_source = seg_reduce((k + eps) * (q_w_sum + eps)) + eps          # (N, G)
    conserved_source = jnp.clip(conserved_source, -1.0, 1.0)

    sink_allocation = jax.nn.sigmoid(conserved_sink * n_ratio)                # (N, G)

    # softmax over the token axis (per head column), times N_k
    m = jnp.max(conserved_source, axis=0, keepdims=True)
    e = jnp.exp(conserved_source - m)
    competition = e * pl.reciprocal(jnp.sum(e, axis=0, keepdims=True), approx=True) * nk

    # per-head kv = k_g^T @ (v_g * comp_g), packed into one block-diagonal
    # (GD, GD) MXU matmul (off-diagonal head blocks masked out).
    vc = v * expand(competition)
    kv = jax.lax.dot_general(
        k.astype(mxu_dtype), vc.astype(mxu_dtype),
        dimension_numbers=(((0,), (0,)), ((), ())),
        preferred_element_type=f32,
    ) * blk                                                                   # (GD, GD)

    out = jnp.dot(q.astype(mxu_dtype), kv.astype(mxu_dtype),
                  preferred_element_type=f32)                                 # (N, GD)
    out = out * sink_in_e * expand(sink_allocation)
    o_ref[...] = out.astype(o_ref.dtype)


def _choose_head_group(H, D):
    """Largest head-group G | H with lane-dense G*D % 128 == 0, capped so the packed
    block-diagonal kv matmul stays small."""
    cap = max(256, D)
    for g in range(H, 0, -1):
        if H % g == 0 and (g * D) % 128 == 0 and g * D <= cap:
            return g
    return None


def flow_attention_core(qkv2d, *, B, N, heads, dim_head, v_div,
                        mxu_dtype=jnp.bfloat16):
    """qkv2d: (B*N, 3*H*D) packed qkv projection -> (B*N, H*D) attention output."""
    H, D = heads, dim_head
    inner = H * D
    assert qkv2d.shape == (B * N, 3 * inner)
    assert v_div != 0, "(scale * C) // heads == 0 would divide v by zero"
    # TODO(synk): add a padded fallback for N % 8 != 0 or head dims with no
    # lane-aligned group (G*D % 128 != 0 for all G | H).
    assert N % 8 == 0, "token count must be a multiple of 8 (f32 sublane tiling)"
    G = _choose_head_group(H, D)
    assert G is not None, "need a head group G | heads with (G*dim_head) % 128 == 0"
    GD = G * D
    HG = H // G

    kern = functools.partial(
        _flow_attention_kernel,
        G=G, D=D, nk=float(N),
        n_ratio=float(N) / float(N),   # q_len / k_len (self-attention -> 1.0)
        inv_vdiv=1.0 / float(v_div),
        mxu_dtype=mxu_dtype,
    )

    itemsize = jnp.dtype(qkv2d.dtype).itemsize
    n_prog = B * HG
    cost = pl.CostEstimate(
        flops=n_prog * (2 * N * GD * G * 4        # 4 segmented lane reductions (MXU)
                        + 2 * N * G * GD * 3      # per-head broadcasts (MXU)
                        + 2 * N * GD * GD * 2),   # packed kv and q @ kv
        transcendentals=n_prog * (2 * N * GD + 4 * N * G),
        bytes_accessed=(3 * B * N * inner + B * N * inner) * itemsize,
    )

    return pl.pallas_call(
        kern,
        out_shape=jax.ShapeDtypeStruct((B * N, inner), qkv2d.dtype),
        grid=(B, HG),
        in_specs=[
            pl.BlockSpec((N, GD), lambda b, g: (b, g)),            # q column window
            pl.BlockSpec((N, GD), lambda b, g: (b, HG + g)),       # k column window
            pl.BlockSpec((N, GD), lambda b, g: (b, 2 * HG + g)),   # v column window
        ],
        out_specs=pl.BlockSpec((N, GD), lambda b, g: (b, g)),      # 'b h n d->b n (h d)'
        compiler_params=pltpu.CompilerParams(
            dimension_semantics=("parallel", "parallel"),
            vmem_limit_bytes=48 * 1024 * 1024,
        ),
        cost_estimate=cost,
    )(qkv2d, qkv2d, qkv2d)


# ----------------------------------------------------------------------------
# Module forward
# ----------------------------------------------------------------------------
def flow_attention_forward(x, params, *, heads, dim_head, mxu_dtype=jnp.bfloat16):
    B, N, C = x.shape
    scale = dim_head ** (-0.5)
    v_div = (scale * C) // heads     # matches torch precedence: (scale*C) // heads

    x2d = x.reshape(B * N, C)
    qkv2d = pallas_matmul(x2d, params["w_qkv"], mxu_dtype=mxu_dtype)   # (B*N, 3*inner)
    attn2d = flow_attention_core(qkv2d, B=B, N=N, heads=heads, dim_head=dim_head,
                                 v_div=v_div, mxu_dtype=mxu_dtype)     # (B*N, inner)
    out2d = pallas_matmul(attn2d, params["w_proj"], params["b_proj"],
                          mxu_dtype=mxu_dtype)                         # (B*N, C)
    return out2d.reshape(B, N, C)


# ----------------------------------------------------------------------------
# Pure-JAX reference (mirrors the PyTorch forward exactly)
# ----------------------------------------------------------------------------
def flow_attention_reference(x, params, *, heads, dim_head):
    B, N, C = x.shape
    inner_dim = heads * dim_head
    scale = dim_head ** (-0.5)
    v_div = (scale * C) // heads
    eps = 1e-6

    qkv = x @ params["w_qkv"]
    qkv = qkv.reshape(B, N, 3, heads, dim_head)
    q = jnp.transpose(qkv[:, :, 0], (0, 2, 1, 3))
    k = jnp.transpose(qkv[:, :, 1], (0, 2, 1, 3))
    v = jnp.transpose(qkv[:, :, 2], (0, 2, 1, 3))

    q = jax.nn.sigmoid(q)
    k = jax.nn.sigmoid(k)
    v = v / v_div

    def my_sum(a, b):
        return jnp.sum(a * b[:, :, None, :], axis=-1)

    sink_incoming = 1.0 / (my_sum(q + eps, k.sum(axis=2) + eps) + eps)
    source_outgoing = 1.0 / (my_sum(k + eps, q.sum(axis=2) + eps) + eps)
    conserved_sink = my_sum(q + eps, (k * source_outgoing[:, :, :, None]).sum(axis=2) + eps) + eps
    conserved_source = my_sum(k + eps, (q * sink_incoming[:, :, :, None]).sum(axis=2) + eps) + eps
    conserved_source = jnp.clip(conserved_source, -1.0, 1.0)
    sink_allocation = jax.nn.sigmoid(conserved_sink * (float(N) / float(N)))
    source_competition = jax.nn.softmax(conserved_source, axis=-1) * float(N)
    kv = jnp.swapaxes(k, -2, -1) @ (v * source_competition[:, :, :, None])
    x_update = q @ kv * sink_incoming[:, :, :, None] * sink_allocation[:, :, :, None]
    x_out = jnp.transpose(x_update, (0, 2, 1, 3)).reshape(B, N, inner_dim)
    return x_out @ params["w_proj"] + params["b_proj"]


# ----------------------------------------------------------------------------
if __name__ == "__main__":
    # small shapes: B=2, N=8 tokens, dim=32, heads=4, dim_head=32 (inner=128)
    B, N, DIM = 2, 8, 32
    HEADS, DIM_HEAD = 4, 32
    INNER = HEADS * DIM_HEAD

    key = jax.random.PRNGKey(0)
    kx, kq, kp, kb = jax.random.split(key, 4)
    x = jax.random.normal(kx, (B, N, DIM), dtype=jnp.float32)

    # deterministic nn.Linear-like uniform init, stored as (in, out)
    bound_qkv = 1.0 / (DIM ** 0.5)
    bound_proj = 1.0 / (INNER ** 0.5)
    params = {
        "w_qkv": jax.random.uniform(kq, (DIM, 3 * INNER), jnp.float32,
                                    -bound_qkv, bound_qkv),
        "w_proj": jax.random.uniform(kp, (INNER, DIM), jnp.float32,
                                     -bound_proj, bound_proj),
        "b_proj": jax.random.uniform(kb, (1, DIM), jnp.float32,
                                     -bound_proj, bound_proj),
    }

    out = flow_attention_forward(x, params, heads=HEADS, dim_head=DIM_HEAD)
    out = jax.block_until_ready(out)

    ref = flow_attention_reference(x, params, heads=HEADS, dim_head=DIM_HEAD)
    ref = jax.block_until_ready(ref)

    assert out.shape == (B, N, DIM), out.shape
    assert bool(jnp.all(jnp.isfinite(out)))
    # tolerance: bf16 MXU operands + approx (EUP) reciprocals vs full-f32 XLA reference
    max_err = float(jnp.max(jnp.abs(out - ref)))
    assert jnp.allclose(out, ref, rtol=2e-2, atol=2e-2), max_err
    print("KERNEL_OK")
</pallas_src>

<mosaic_0001>
module attributes {stable_mosaic.version = 11 : i64} {
  func.func @_matmul_kernel(%arg0: i32, %arg1: i32, %arg2: i32, %arg3: memref<16x32xf32, #tpu.memory_space<vmem>>, %arg4: memref<32x128xf32, #tpu.memory_space<vmem>>, %arg5: memref<16x128xf32, #tpu.memory_space<vmem>>, %arg6: memref<16x128xf32, #tpu.memory_space<vmem>>) attributes {dimension_semantics = [#tpu.dimension_semantics<parallel>, #tpu.dimension_semantics<parallel>, #tpu.dimension_semantics<arbitrary>], iteration_bounds = array<i64: 1, 3, 1>, scalar_prefetch = 0 : i64, scratch_operands = 1 : i64, tpu.core_type = #tpu.core_type<tc>, window_params = [{transform_indices = @transform_0, window_bounds = array<i64: 16, 32>}, {transform_indices = @transform_1, window_bounds = array<i64: 32, 128>}, {transform_indices = @transform_2, window_bounds = array<i64: 16, 128>}]} {
    %c0_i32 = arith.constant 0 : i32
    %0 = arith.cmpi eq, %arg2, %c0_i32 : i32
    %1 = arith.extui %0 : i1 to i32
    %c0_i32_0 = arith.constant 0 : i32
    %2 = arith.cmpi ne, %1, %c0_i32_0 : i32
    scf.if %2 {
      %cst_10 = arith.constant 0.000000e+00 : f32
      %14 = vector.broadcast %cst_10 : f32 to vector<16x128xf32>
      %c0_11 = arith.constant 0 : index
      %c0_12 = arith.constant 0 : index
      %15 = vector.load %arg6[%c0_11, %c0_12] : memref<16x128xf32, #tpu.memory_space<vmem>>, vector<16x128xf32>
      tpu.vector_store %arg6[%c0_11, %c0_12], %14 {strides = array<i32>} : memref<16x128xf32, #tpu.memory_space<vmem>>, vector<16x128xf32>,
    } else {
    }
    %c0 = arith.constant 0 : index
    %c0_1 = arith.constant 0 : index
    %3 = vector.load %arg6[%c0, %c0_1] : memref<16x128xf32, #tpu.memory_space<vmem>>, vector<16x128xf32>
    %c0_2 = arith.constant 0 : index
    %c0_3 = arith.constant 0 : index
    %4 = vector.load %arg3[%c0_2, %c0_3] : memref<16x32xf32, #tpu.memory_space<vmem>>, vector<16x32xf32>
    %5 = arith.truncf %4 : vector<16x32xf32> to vector<16x32xbf16>
    %c0_4 = arith.constant 0 : index
    %c0_5 = arith.constant 0 : index
    %6 = vector.load %arg4[%c0_4, %c0_5] : memref<32x128xf32, #tpu.memory_space<vmem>>, vector<32x128xf32>
    %7 = arith.truncf %6 : vector<32x128xf32> to vector<32x128xbf16>
    %cst = arith.constant dense<0.000000e+00> : vector<16x128xf32>
    %8 = tpu.matmul %5, %7, %cst {dimension_numbers = #tpu.dot_dimension_numbers<[1], [0], [0], [1], [0, 0, 1, 1], [], []>} : vector<16x32xbf16>, vector<32x128xbf16>, vector<16x128xf32> -> vector<16x128xf32>
    %9 = arith.addf %3, %8 : vector<16x128xf32>
    %c0_6 = arith.constant 0 : index
    %c0_7 = arith.constant 0 : index
    %10 = vector.load %arg6[%c0_6, %c0_7] : memref<16x128xf32, #tpu.memory_space<vmem>>, vector<16x128xf32>
    tpu.vector_store %arg6[%c0_6, %c0_7], %9 {strides = array<i32>} : memref<16x128xf32, #tpu.memory_space<vmem>>, vector<16x128xf32>,
    %c0_i32_8 = arith.constant 0 : i32
    %11 = arith.cmpi eq, %arg2, %c0_i32_8 : i32
    %12 = arith.extui %11 : i1 to i32
    %c0_i32_9 = arith.constant 0 : i32
    %13 = arith.cmpi ne, %12, %c0_i32_9 : i32
    scf.if %13 {
      %c0_10 = arith.constant 0 : index
      %c0_11 = arith.constant 0 : index
      %14 = vector.load %arg6[%c0_10, %c0_11] : memref<16x128xf32, #tpu.memory_space<vmem>>, vector<16x128xf32>
      %c0_12 = arith.constant 0 : index
      %c0_13 = arith.constant 0 : index
      %15 = vector.load %arg5[%c0_12, %c0_13] : memref<16x128xf32, #tpu.memory_space<vmem>>, vector<16x128xf32>
      tpu.vector_store %arg5[%c0_12, %c0_13], %14 {strides = array<i32>} : memref<16x128xf32, #tpu.memory_space<vmem>>, vector<16x128xf32>,
    } else {
    }
    return
  }
  func.func @transform_0(%arg0: i32, %arg1: i32, %arg2: i32) -> (i32, i32) {
    %c0_i32 = arith.constant 0 : i32
    return %arg0, %arg2 : i32, i32
  }
  func.func @transform_1(%arg0: i32, %arg1: i32, %arg2: i32) -> (i32, i32) {
    %c0_i32 = arith.constant 0 : i32
    return %arg2, %arg1 : i32, i32
  }
  func.func @transform_2(%arg0: i32, %arg1: i32, %arg2: i32) -> (i32, i32) {
    %c0_i32 = arith.constant 0 : i32
    return %arg0, %arg1 : i32, i32
  }
}

</mosaic_0001>

<bundles_post_ra>
// kernel: tpu_custom_call.1
= control target key start
LH: loop header
LB: loop body
LE: loop exit
PB: predicated region body
PF: predicated region fallthrough
CT: control target
= control target key end

     0   :  { %7 = vsyncpa [#allocation4], 0  ;;  %s907_s0 = inlined_call_operand.hbm [shape: f32[16,32], index: 0, kind: input, shape index: {}]   ;;  %s908_s1 = inlined_call_operand.hbm [shape: f32[32,384], index: 1, kind: input, shape index: {}]   ;;  %s909_s2 = inlined_call_operand.hbm [shape: f32[16,384], index: 2, kind: output, shape index: {}]  }
   0x1   :  { %8 = vsyncpa [#allocation7], 0 }
   0x2   :  { %10 = vsyncpa [#allocation7 + $0x1], 0 }
   0x3   :  { %11 = vsyncpa [#allocation5], 0 }
   0x4   :  { %13 = vsyncpa [#allocation5 + $0x1], 0  ;;  %s690_s9 = smov 0   ;;  %s692_s10 = smov 0  }
   0x5   :  { %s694_s11 = smov 0   ;;  %s696_s12 = smov 0  }
   0x6   :  { %s698_s13 = smov 0   ;;  %s700_s14 = smov 0  }
   0x7 LB: > { %s410_s15 = sadd.s32 4294967295, %s662_s14   ;;  %s411_s16 = sadd.s32 4294967294, %s662_s14   ;;  %s662_s14 = sphi %s700_s14, %s19_s14   ;;  %s658_s13 = sphi %s698_s13, %s934_s13   ;;  %s654_s12 = sphi %s696_s12, %s933_s12   ;;  %s650_s11 = sphi %s694_s11, %s932_s11   ;;  %s646_s10 = sphi %s692_s10, %s931_s10   ;;  %s642_s9 = sphi %s690_s9, %s930_s9  }
   0x8   : > { %p82_p0 = scmp.ne.s32.totalorder %s650_s11, %s646_s10  ;;  %p83_p1 = scmp.eq.s32.totalorder %s662_s14, 0 }
   0x9   : > { %p88_p2 = scmp.ne.s32.totalorder %s646_s10, %s642_s9  ;;  %p727_p3 = scmp.eq.s32.totalorder %s410_s15, 0 }
   0xa   : > { %p731_p4 = por %p83_p1, %p82_p0  ;;  %p114_p5 = scmp.eq.s32.totalorder %s410_s15, 2 }
   0xb   : > { %s916_s17 = scalar_select %p727_p3, 1, 0 }
   0xc   : > { %p737_p6 = por %p727_p3, %p88_p2  ;;  %p120_p7 = scmp.eq.s32.totalorder %s411_s16, 2 }
   0xd   : > { %p741_p8 = por %p114_p5, %p82_p0  ;;  %p412_p9 = scmp.ge.s32.totalorder %s662_s14, 1 }
   0xe   : > { %s918_s19 = scalar_select %p737_p6, 1, 0 }
   0xf   : > { %s919_s20 = scalar_select %p741_p8, 1, 0 }
  0x10   : > { %p746_p10 = por %p120_p7, %p88_p2  ;;  %p127_p11 = scmp.lt.s32.totalorder %s662_s14, 4 }
  0x11   : > { %s664_s23 = smov [#allocation3]   ;;  %p458_p0 = scmp.lt.s32.totalorder %s662_s14, 3 }
  0x12   : > { %s920_s21 = scalar_select %p746_p10, 1, 0 }
  0x13   : > { %p751_p12 = pnand %p412_p9, %p127_p11  ;;  %s143_s24 = sshll.u32 %s664_s23, 4  ;;  %s144_s24 = int_to_ptr.vmem [resolvable:$true] %s143_s24 }
  0x14   : > { %p766_p2 = pnand %p458_p0, %p731_p4  ;;  %s34_s27 = sadd.s32 1, %s658_s13 }
  0x15   : > { %s921_s22 = scalar_select %p751_p12, 1, 0 }
  0x16   : > { %p445_p13 = pneg %p751_p12  ;;  %s518_s30 = scalar_lea.hbm %s907_s0, 256 }
  0x17   : > { %s923_s26 = scalar_select %p766_p2, 1, 0 }
  0x18   : > { %p760_p1 = pnand %p445_p13, %p727_p3  ;;  %p519_p5 = scmp.ne.s32.totalorder %s907_s0, %s518_s30 }
  0x19   : > { %p525_p4 = scmp.lt.u32.totalorder %s518_s30, %s907_s0 }
  0x1a   : > { %p520_p7 = pneg %p760_p1 }
  0x1c   : > { %p521_p9 = pnand %p520_p7, %p519_p5 }
  0x1e   : > { %p522_p11 = pneg %p521_p9 }
  0x20   : > { %p527_p13 = pnand %p525_p4, %p522_p11 }
  0x22   : > { %530 = shalt.err (!%p527_p13)
}
  0x23   : > { %s531_s7 = scalar_lea.vmem %s144_s24, 256  ;;  %p539_p6 = scmp.lt.s32.totalorder %s144_s24, %s144_s24 }
  0x24   : > { %p532_p0 = scmp.ne.s32.totalorder %s144_s24, %s531_s7  ;;  %p540_p3 = scmp.lt.s32.totalorder %s531_s7, %s531_s7 }
  0x26   : > { %p534_p10 = pnand %p532_p0, %p520_p7  ;;  %p541_p12 = por %p540_p3, %p539_p6 }
  0x28   : > { %p535_p8 = pneg %p534_p10 }
  0x2a   : > { %p542_p2 = pnand %p541_p12, %p535_p8 }
  0x2c   : > { %545 = shalt.err (!%p542_p2)
}
  0x2d   : > { %s665_s8 = smov 128   ;;  %s666_s15 = smov 8  }
  0x2e   : > { %448 = dma.hbm_to_vmem [thread:$0]  (!%p760_p1), %s907_s0, 256, %s144_s24, [#allocation4], %s665_s8, %s665_s8, %s666_s15  }
  0x2f   : > { %p36_p10 = scmp.ge.s32.totalorder %s34_s27, 3  ;;  %s75_s23 = sadd.s32 1, %s650_s11 }
  0x30   : > { %s157_s28 = sand.u32 1, %s650_s11   ;;  %s416_s3 = sshll.u32 %s658_s13, 7 }
  0x31   : > { %s936_s27 = smov (%p36_p10, %s34_s27), 0  ;;  %s415_s29 = sshll.u32 %s157_s28, 5 }
  0x32   : > { %s71_s30 = ssub.s32 %s658_s13, %s936_s27  ;;  %s800_s5 = scalar_lea.hbm %s908_s1, %s416_s3 }
  0x33   : > { %p73_p3 = scmp.eq.s32.totalorder %s71_s30, 0  ;;  %s161_s24 = scalar_lea.vmem [#allocation6], %s415_s29 }
  0x34   : > { %s170_s6 = sshll.u32 %s161_s24, 4  ;;  %s807_s16 = scalar_lea.sflag [#allocation7], %s157_s28  ;;  %s805_s6 = int_to_ptr.vmem [resolvable:$true] %s170_s6 }
  0x35   : > { %s803_s7 = scalar_select %p73_p3, %s650_s11, %s75_s23  }
  0x36   : > { %s546_s18 = scalar_lea.hbm %s800_s5, 512  ;;  %p924_p8 = scmp.ne.s32.totalorder %s923_s26, 0 }
  0x37   : > { %p547_p6 = scmp.ne.s32.totalorder %s800_s5, %s546_s18  ;;  %s551_s25 = scalar_lea.hbm %s908_s1, 1536 }
  0x38   : > { %p548_p12 = pneg %p924_p8  ;;  %p552_p5 = scmp.lt.u32.totalorder %s800_s5, %s908_s1 }
  0x39   : > { %p553_p7 = scmp.lt.u32.totalorder %s551_s25, %s546_s18  ;;  %p555_p11 = scmp.lt.u32.totalorder %s546_s18, %s800_s5 }
  0x3a   : > { %p549_p1 = pnand %p548_p12, %p547_p6 }
  0x3b   : > { %p554_p9 = por %p553_p7, %p552_p5 }
  0x3c   : > { %p550_p2 = pneg %p549_p1 }
  0x3d   : > { %p556_p4 = por %p555_p11, %p554_p9 }
  0x3f   : > { %p557_p13 = pnand %p556_p4, %p550_p2 }
  0x41   : > { %560 = shalt.err (!%p557_p13)
}
  0x42   : > { %s561_s23 = scalar_lea.vmem %s805_s6, 512  ;;  %s667_s28 = smov [#allocation6]  }
  0x43   : > { %p562_p0 = scmp.ne.s32.totalorder %s805_s6, %s561_s23  ;;  %s566_s24 = sshll.u32 %s667_s28, 4  ;;  %s567_s24 = int_to_ptr.vmem [resolvable:$false] %s566_s24 }
  0x44   : > { %s568_s30 = scalar_lea.vmem %s567_s24, 1024  ;;  %p569_p6 = scmp.lt.s32.totalorder %s805_s6, %s567_s24 }
  0x45   : > { %p564_p10 = pnand %p562_p0, %p548_p12  ;;  %p570_p1 = scmp.lt.s32.totalorder %s568_s30, %s561_s23 }
  0x47   : > { %p565_p3 = pneg %p564_p10  ;;  %p571_p5 = por %p570_p1, %p569_p6 }
  0x49   : > { %p572_p7 = pnand %p571_p5, %p565_p3 }
  0x4b   : > { %575 = shalt.err (!%p572_p7)
}
  0x4c   : > { %s668_s18 = smov 384   ;;  %p925_p12 = scmp.ne.s32.totalorder %s921_s22, 0 }
  0x4d   : > { %452 = dma.hbm_to_vmem [thread:$0]  (!%p924_p8), %s800_s5, 512, %s805_s6, %s807_s16, %s668_s18, %s665_s8, %s666_s15  }
  0x4e   : > { %182 = sbr.rel (%p925_p12) target bundleno = 330 (0x14a), region = 28  ;;  %p926_p2 = scmp.ne.s32.totalorder (!%p925_p12), %s916_s17, 0 }
  0x55   : > { %629 = dma.done.wait (%p926_p2), [#allocation4], 256  }
  0x56   : > { %631 = vsyncadd (%p926_p2), [#allocation4], 4294967040  ;;  %s844_s3 = sand.u32 1, %s646_s10   ;;  %p927_p9 = scmp.ne.s32.totalorder %s918_s19, 0 }
  0x57   : > { %s419_s26 = sshll.u32 %s844_s3, 5  ;;  %s189_s25 = scalar_lea.sflag [#allocation7], %s844_s3 }
  0x58   : > { %s192_s29 = scalar_lea.vmem [#allocation6], %s419_s26 }
  0x59   : > { %633 = dma.done.wait (%p927_p9), %s189_s25, 512  }
  0x5a   : > { %635 = vsyncadd (%p927_p9), %s189_s25, 4294966784  ;;  %v669_v0 = vmov 0.0   ;;  %vm670_vm0 = vmmov 0   ;;  %v228_v1 = vld [vmem:[%s192_s29] sm:$0xff]  ;;  %v229_v2 = vld [vmem:[%s192_s29 + $0x8] sm:$0xff]  ;;  %vm234_vm1 = vcmask 261120  }
  0x5b   : > { %429 = vmatprep.subr.bf16.mxu0 %v669_v0  ;;  %433 = vmatprep.mubr.msk.bf16.mxu0 %vm670_vm0, %v669_v0  ;;  %v230_v3 = vld [vmem:[%s192_s29 + $0x10] sm:$0xff]  ;;  %v232_v4 = vpack.c.bf16 %v229_v2, %v228_v1  ;;  %v231_v5 = vld [vmem:[%s192_s29 + $0x18] sm:$0xff]  ;;  %s420_s17 = sshll.u32 %s844_s3, 4  ;;  %s423_s8 = sshll.u32 %s654_s12, 7 }
  0x5c   : > { %v233_v6 = vpack.c.bf16 %v231_v5, %v230_v3  ;;  %v225_v7 = vld [vmem:[#allocation3] sm:$0xff]  ;;  %v226_v8 = vld [vmem:[#allocation3 + $0x8] sm:$0xff]  ;;  %s212_s19 = scalar_lea.vmem [#allocation8], %s420_s17  ;;  %s859_s6 = scalar_lea.hbm %s909_s2, %s423_s8 }
  0x5d   : > { %430 = vmatpush3.bf16.msra.mxu0 %v232_v4  ;;  %v227_v9 = vpack.c.bf16 %v226_v8, %v225_v7  ;;  %s306_s22 = sshll.u32 %s212_s19, 4  ;;  %s291_s16 = scalar_lea.sflag [#allocation5], %s844_s3  ;;  %s854_s22 = int_to_ptr.vmem [resolvable:$true] %s306_s22 }
  0x5e   : > { %431 = vmatprep.subr.bf16.mxu0 %v669_v0  ;;  %s576_s4 = scalar_lea.vmem %s854_s22, 256  ;;  %p928_p11 = scmp.ne.s32.totalorder %s919_s20, 0 }
  0x5f   : > { %p577_p8 = scmp.ne.s32.totalorder %s854_s22, %s576_s4  ;;  %s671_s12 = smov [#allocation8]  }
  0x60   : > { %s580_s23 = sshll.u32 %s671_s12, 4  ;;  %s581_s23 = int_to_ptr.vmem [resolvable:$false] %s580_s23 }
  0x61   : > { %432 = vmatpush3.bf16.msra.mxu0 %v233_v6  ;;  %p578_p4 = pnand %p577_p8, %p928_p11  ;;  %s582_s28 = scalar_lea.vmem %s581_s23, 512 }
  0x62   : > { %p583_p0 = scmp.lt.s32.totalorder %s854_s22, %s581_s23  ;;  %p584_p10 = scmp.lt.s32.totalorder %s582_s28, %s576_s4 }
  0x63   : > { %p579_p13 = pneg %p578_p4 }
  0x64   : > { %434 = vmatmul.mubr.msk.bf16.vlgmr.msra.gmra.mrb[0].mxu0 %vm234_vm1, %v227_v9  ;;  %p585_p3 = por %p584_p10, %p583_p0 }
  0x66   : > { %p586_p6 = pnand %p585_p3, %p579_p13 }
 0x137   : > { %v272_v10 = vpop.f32.mrb[0].mxu0 }
 0x138   : > { %288 = vst [vmem:[%s212_s19] sm:$0xff] %v272_v10  ;;  %v435_v11 = vpop.f32.mrb[1].mxu0 }
 0x139   : > { %v275_v12 = vpop.f32.mrb[2].mxu0 }
 0x13a   : > { %289 = vst [vmem:[%s212_s19 + $0x8] sm:$0xff] %v275_v12  ;;  %v436_v13 = vpop.f32.mrb[3].mxu0 }
 0x13b   : > { %589 = shalt.err (!%p586_p6)
}
 0x13c   : > { %s590_s24 = scalar_lea.hbm %s859_s6, 256  ;;  %s594_s26 = scalar_lea.hbm %s909_s2, 768 }
 0x13d   : > { %p591_p1 = scmp.ne.s32.totalorder %s859_s6, %s590_s24  ;;  %p595_p12 = scmp.lt.u32.totalorder %s859_s6, %s909_s2 }
 0x13e   : > { %p596_p2 = scmp.lt.u32.totalorder %s594_s26, %s590_s24  ;;  %p598_p8 = scmp.lt.u32.totalorder %s590_s24, %s859_s6 }
 0x13f   : > { %p592_p5 = pnand %p591_p1, %p928_p11 }
 0x140   : > { %p597_p9 = por %p596_p2, %p595_p12 }
 0x141   : > { %p593_p7 = pneg %p592_p5 }
 0x142   : > { %p599_p4 = por %p598_p8, %p597_p9 }
 0x144   : > { %p600_p13 = pnand %p599_p4, %p593_p7 }
 0x146   : > { %603 = shalt.err (!%p600_p13)
}
 0x147   : > { %s672_s17 = smov 128   ;;  %s673_s19 = smov 384  }
 0x148   : > { %s674_s8 = smov 8  }
 0x149   : > { %443 = dma.vmem_to_hbm [thread:$0]  (%p928_p11), %s854_s22, 256, %s859_s6, %s291_s16, %s672_s17, %s673_s19, %s674_s8  }
 0x14a PF: > { %p460_p0 = scmp.ge.s32.totalorder %s662_s14, 2  ;;  %s321_s15 = sand.u32 1, %s642_s9  }
 0x14b   : > { %p929_p10 = scmp.ne.s32.totalorder %s920_s21, 0  ;;  %s322_s5 = scalar_lea.sflag [#allocation5], %s321_s15 }
 0x14d   : > { %p454_p3 = pnand %p460_p0, %p929_p10 }
 0x14f   : > { %637 = dma.done.wait (!%p454_p3), %s322_s5, 256  }
 0x150   : > { %639 = vsyncadd (!%p454_p3), %s322_s5, 4294967040  ;;  %s19_s14 = sadd.s32 1, %s662_s14   ;;  %s930_s9 = smov %s646_s10 }
 0x151   : > { %p16_p6 = scmp.ge.s32.totalorder %s19_s14, 5   ;;  %s931_s10 = smov %s650_s11 }
 0x152   : > { %s932_s11 = smov %s803_s7  ;;  %s933_s12 = smov %s658_s13 }
 0x153   : > { %s934_s13 = smov %s936_s27  ;;  %18 = sbr.rel (!%p16_p6) target bundleno = 7 (0x7), region = 87 }
 0x15a   :  { %327 = vsyncpa [#allocation4], 1 }
 0x15b   :  { %329 = vsyncpa [#allocation4 + $0x1], 1 }
 0x15c   :  { %330 = vsyncpa [#allocation7], 1 }
 0x15d   :  { %332 = vsyncpa [#allocation7 + $0x1], 1 }
 0x15e   :  { %333 = vsyncpa [#allocation5], 1 }
 0x15f   :  { %335 = vsyncpa [#allocation5 + $0x1], 1 }

</bundles_post_ra>
